<compile_context>
chip_gen: v7x
topology: tpu7x:2x2x1
jax: 0.10.0
libtpu: 0.0.40
codegen_flags: <defaults>
</compile_context>

<pallas_src>
import functools

import jax
import jax.numpy as jnp
import numpy as np
from jax.experimental import pallas as pl
from jax.experimental.pallas import tpu as pltpu

LANE = 128


def _round_up(n, m):
    return (n + m - 1) // m * m


def _vmem_budget_bytes():
    """~75% of physical per-core VMEM (headroom for Mosaic internal temps).
    Falls back to the smallest current generation (v7x: 64 MiB/TC) if the
    hardware query is unavailable."""
    total = 64 * 1024 * 1024
    try:
        cap = getattr(pltpu.get_tpu_info(), "vmem_capacity_bytes", None)
        if cap:
            total = int(cap)
    except Exception:
        pass
    return (total * 3) // 4


def _block_footprint_bytes(bb, Tp, Cp, Dp, Fp, cdt_bytes, out_bytes):
    """Per-grid-step VMEM footprint, including double buffers and f32 temps."""
    x_blk = 2 * bb * Tp * Cp * cdt_bytes            # double-buffered input block
    o_blk = 2 * bb * Tp * Fp * out_bytes            # double-buffered output block
    qkv = bb * Tp * 3 * Dp * (4 + cdt_bytes)        # f32 fused QKV + cdt q/k/v copies
    logits = bb * Tp * Tp * (2 * 4 + cdt_bytes)     # f32 logits + exp, cdt copy for PV
    attn = bb * Tp * Dp * 2 * 4                     # f32 PV accum + normalized result
    return x_blk + o_blk + qkv + logits + attn


def _pick_block_b(B, Tp, Cp, Dp, Fp, cdt_bytes, out_bytes, act_budget,
                  target_rows=512):
    """Largest divisor of B whose per-step footprint fits `act_budget`, stopping
    once the MXU M dimension (bb*Tp) reaches `target_rows` (512 keeps two
    256-wide MXU passes in flight on v6e/v7x; harmless overkill on v5e's
    128-wide MXU).  Capped at B//2 so a v7x megacore always gets >= 2 steps."""
    max_bb = B if B < 2 else B // 2
    best = 1
    for bb in range(1, max_bb + 1):
        if B % bb:
            continue
        if bb > 1 and _block_footprint_bytes(
                bb, Tp, Cp, Dp, Fp, cdt_bytes, out_bytes) > act_budget:
            break
        best = bb
        if bb * Tp >= target_rows:
            break
    return best


def _self_attention_kernel(x_ref, wqkv_ref, wp_ref, o_ref, *, T, Tp, Dp,
                           compute_dtype):
    Bb, _, Cp = x_ref.shape
    Fp = o_ref.shape[2]
    cdt = compute_dtype
    approx = np.dtype(cdt) != np.dtype(jnp.float32)

    # Fused QKV projection on (Bb*Tp) rows -- fills the MXU M dimension.
    x2 = x_ref[...].reshape(Bb * Tp, Cp)
    qkv = jnp.dot(x2, wqkv_ref[...], preferred_element_type=jnp.float32)
    qkv = qkv.reshape(Bb, Tp, 3 * Dp)
    q = qkv[:, :, 0:Dp].astype(cdt)          # 1/dk scale already folded into wq
    k = qkv[:, :, Dp:2 * Dp].astype(cdt)
    v = qkv[:, :, 2 * Dp:3 * Dp].astype(cdt)

    # Batched q @ k^T by contracting the shared feature axis: lowers to a
    # dot_general with both contracting dims minor -> no explicit XLU transpose.
    logits = jnp.einsum("btd,bsd->bts", q, k,
                        preferred_element_type=jnp.float32)      # (Bb,Tp,Tp) f32

    if Tp != T:  # static branch: only emitted when key padding exists
        col = jax.lax.broadcasted_iota(jnp.int32, (1, 1, Tp), 2)
        logits = logits + jnp.where(col < T, 0.0, -1e9)          # (1,1,Tp) bias

    # Numerically stable softmax; reductions / exp strictly f32 (v5e has no
    # bf16 VPU/EUP).  Normalize AFTER the PV matmul: the reciprocal scale hits
    # the (Tp, Dp) result instead of the (Tp, Tp) probabilities and no
    # (Tp, Tp) `score` temp is materialized.
    m = jnp.max(logits, axis=-1, keepdims=True)
    p = jnp.exp(logits - m)
    denom = jnp.sum(p, axis=-1, keepdims=True)                   # (Bb,Tp,1) f32

    attn = jnp.einsum("bts,bsd->btd", p.astype(cdt), v,
                      preferred_element_type=jnp.float32)        # un-normalized PV
    attn = attn * pl.reciprocal(denom, approx=approx)            # EUP slot

    # Output projection, again on (Bb*Tp) rows.
    y = jnp.dot(attn.reshape(Bb * Tp, Dp).astype(cdt), wp_ref[...],
                preferred_element_type=jnp.float32)
    o_ref[...] = y.reshape(Bb, Tp, Fp).astype(o_ref.dtype)


def prepare_self_attention_weights(wq, wk, wv, wproj, d_model,
                                   compute_dtype=jnp.bfloat16):
    """Fuse / pad / scale the weights.  Hoisted out of the per-call path: for
    inference loops cache this result and call self_attention_pallas_prepacked
    directly (under jit with constant weights XLA will fold it anyway)."""
    C, D = wq.shape
    F = wproj.shape[1]
    assert wq.shape == (C, D) and wk.shape == (C, D) and wv.shape == (C, D)
    assert wproj.shape == (D, F)

    # PyTorch: dk = sqrt(1/d_model); logits / dk == logits * sqrt(d_model).
    # (Folding the scale into wq before the bf16 cast is a deliberate,
    # within-tolerance numerical change.)
    inv_dk = float(np.sqrt(float(d_model)))

    Cp, Dp, Fp = _round_up(C, LANE), _round_up(D, LANE), _round_up(F, LANE)

    def pad2(w, r, c):
        return jnp.pad(w, ((0, r - w.shape[0]), (0, c - w.shape[1])))

    wqkv_p = jnp.concatenate(
        [pad2(wq * inv_dk, Cp, Dp), pad2(wk, Cp, Dp), pad2(wv, Cp, Dp)],
        axis=1).astype(compute_dtype)                    # (Cp, 3*Dp)
    wp_p = pad2(wproj, Dp, Fp).astype(compute_dtype)     # (Dp, Fp)
    return wqkv_p, wp_p, (C, D, F)


def self_attention_pallas_prepacked(x, wqkv_p, wp_p, dims, *,
                                    compute_dtype=jnp.bfloat16,
                                    out_dtype=None, block_b=None):
    """x: (B, T, C).  wqkv_p/wp_p/dims from prepare_self_attention_weights."""
    B, T, C = x.shape
    C0, D, F = dims
    assert C == C0
    Cp = wqkv_p.shape[0]
    Dp = wqkv_p.shape[1] // 3
    Fp = wp_p.shape[1]

    # out_dtype=jnp.bfloat16 halves output HBM writeback if the consumer
    # tolerates bf16; default preserves the input dtype for module parity.
    out_dtype = x.dtype if out_dtype is None else out_dtype
    cdt_bytes = np.dtype(compute_dtype).itemsize
    out_bytes = np.dtype(out_dtype).itemsize

    # bf16 packs two rows per sublane -> round T to 16 so blocks tile cleanly.
    sub = 16 if cdt_bytes == 2 else 8
    Tp = _round_up(T, sub)

    x_p = jnp.pad(x, ((0, 0), (0, Tp - T), (0, Cp - C))).astype(compute_dtype)

    vmem_budget = _vmem_budget_bytes()
    # Resident weights use a constant index_map but are still double-buffered.
    weight_bytes = 2 * (Cp * 3 * Dp + Dp * Fp) * cdt_bytes
    act_budget = vmem_budget - weight_bytes
    min_foot = _block_footprint_bytes(1, Tp, Cp, Dp, Fp, cdt_bytes, out_bytes)
    if weight_bytes + min_foot > vmem_budget:
        # TODO(synk): tile the fused QKV / projection weights over a grid axis
        # (with an f32 accumulator) once d_model is large enough that the
        # resident weights no longer fit the per-generation VMEM budget.
        raise ValueError(
            f"fused weights ({weight_bytes / 2**20:.1f} MiB) + minimal block "
            f"({min_foot / 2**20:.1f} MiB) exceed the VMEM budget "
            f"({vmem_budget / 2**20:.1f} MiB); weight tiling not implemented")

    if block_b is None:
        block_b = _pick_block_b(B, Tp, Cp, Dp, Fp, cdt_bytes, out_bytes,
                                act_budget)
    assert B % block_b == 0

    kernel = functools.partial(_self_attention_kernel,
                               T=T, Tp=Tp, Dp=Dp, compute_dtype=compute_dtype)

    y_p = pl.pallas_call(
        kernel,
        out_shape=jax.ShapeDtypeStruct((B, Tp, Fp), out_dtype),
        grid_spec=pltpu.PrefetchScalarGridSpec(
            num_scalar_prefetch=0,
            grid=(B // block_b,),
            in_specs=[
                pl.BlockSpec((block_b, Tp, Cp), lambda b: (b, 0, 0)),  # x block
                pl.BlockSpec((Cp, 3 * Dp), lambda b: (0, 0)),          # fused QKV W
                pl.BlockSpec((Dp, Fp), lambda b: (0, 0)),              # projection W
            ],
            out_specs=pl.BlockSpec((block_b, Tp, Fp), lambda b: (b, 0, 0)),
        ),
        compiler_params=pltpu.CompilerParams(
            # "parallel" lets the runtime shard the >=2 batch steps across
            # megacore / v7x's 2 TCs without changing codegen.
            dimension_semantics=("parallel",),
            vmem_limit_bytes=vmem_budget,
        ),
    )(x_p, wqkv_p, wp_p)

    if Tp == T and Fp == F:
        return y_p          # no padding -> no slice copy
    return y_p[:, :T, :F]


def self_attention_pallas(x, wq, wk, wv, wproj, d_model, *,
                          compute_dtype=jnp.bfloat16, out_dtype=None,
                          block_b=None):
    wqkv_p, wp_p, dims = prepare_self_attention_weights(
        wq, wk, wv, wproj, d_model, compute_dtype=compute_dtype)
    return self_attention_pallas_prepacked(
        x, wqkv_p, wp_p, dims, compute_dtype=compute_dtype,
        out_dtype=out_dtype, block_b=block_b)


def self_attention_ref(x, wq, wk, wv, wproj, d_model, compute_dtype=jnp.float32):
    """Pure-JAX reference. compute_dtype=bf16 mirrors the kernel's MXU casts
    (f32 accumulation); compute_dtype=f32 is the plain PyTorch-equivalent math."""
    cdt = compute_dtype
    inv_dk = float(np.sqrt(float(d_model)))
    xm = x.astype(cdt)
    q = jnp.dot(xm, (wq * inv_dk).astype(cdt), preferred_element_type=jnp.float32)
    k = jnp.dot(xm, wk.astype(cdt), preferred_element_type=jnp.float32)
    v = jnp.dot(xm, wv.astype(cdt), preferred_element_type=jnp.float32)
    logits = jnp.einsum("btd,bsd->bts", q.astype(cdt), k.astype(cdt),
                        preferred_element_type=jnp.float32)
    score = jax.nn.softmax(logits, axis=-1)
    attn = jnp.einsum("bts,bsd->btd", score.astype(cdt), v.astype(cdt),
                      preferred_element_type=jnp.float32)
    return jnp.dot(attn.astype(cdt), wproj.astype(cdt),
                   preferred_element_type=jnp.float32)


if __name__ == "__main__":
    # Small shapes consistent with SelfAttention.forward:
    # x: (batch, seq, in_features); d_model == in_features here, no bias.
    B, T = 2, 8
    in_features, d_model, out_features = 32, 32, 32

    key = jax.random.PRNGKey(0)
    kx, kq, kk, kv, kp = jax.random.split(key, 5)

    x = jax.random.normal(kx, (B, T, in_features), dtype=jnp.float32)

    # PyTorch nn.Linear weight is (out, in); we store the transpose (in, out)
    # so the kernel computes x @ W directly.
    scale_in = 1.0 / np.sqrt(in_features)
    scale_d = 1.0 / np.sqrt(d_model)
    wq = jax.random.uniform(kq, (in_features, d_model), jnp.float32, -scale_in, scale_in)
    wk = jax.random.uniform(kk, (in_features, d_model), jnp.float32, -scale_in, scale_in)
    wv = jax.random.uniform(kv, (in_features, d_model), jnp.float32, -scale_in, scale_in)
    wproj = jax.random.uniform(kp, (d_model, out_features), jnp.float32, -scale_d, scale_d)

    y = self_attention_pallas(x, wq, wk, wv, wproj, d_model)  # bf16 MXU path
    y = jax.block_until_ready(y)
    y = np.asarray(y)
    assert y.shape == (B, T, out_features)

    # (a) precision-matched reference (same bf16 casts, f32 accumulation):
    #     tight check of tiling / fusion / padding / post-PV normalization.
    y_ref_matched = np.asarray(
        self_attention_ref(x, wq, wk, wv, wproj, d_model, compute_dtype=jnp.bfloat16))
    np.testing.assert_allclose(y, y_ref_matched, rtol=2e-2, atol=2e-2)

    # (b) pure-f32 reference: end-to-end sanity within bf16 precision.
    y_ref_f32 = np.asarray(
        self_attention_ref(x, wq, wk, wv, wproj, d_model, compute_dtype=jnp.float32))
    np.testing.assert_allclose(y, y_ref_f32, rtol=1e-1, atol=1e-1)

    print("KERNEL_OK")
</pallas_src>

<mosaic_0001>
module attributes {stable_mosaic.version = 11 : i64} {
  func.func @_self_attention_kernel(%arg0: i32, %arg1: memref<1x16x128xbf16, #tpu.memory_space<vmem>>, %arg2: memref<128x384xbf16, #tpu.memory_space<vmem>>, %arg3: memref<128x128xbf16, #tpu.memory_space<vmem>>, %arg4: memref<1x16x128xf32, #tpu.memory_space<vmem>>) attributes {dimension_semantics = [#tpu.dimension_semantics<parallel>], iteration_bounds = array<i64: 2>, scalar_prefetch = 0 : i64, scratch_operands = 0 : i64, tpu.core_type = #tpu.core_type<tc>, window_params = [{transform_indices = @transform_0, window_bounds = array<i64: 1, 16, 128>}, {pipeline_mode = #tpu.pipeline_mode<synchronous>, transform_indices = @transform_1, window_bounds = array<i64: 128, 384>}, {pipeline_mode = #tpu.pipeline_mode<synchronous>, transform_indices = @transform_2, window_bounds = array<i64: 128, 128>}, {transform_indices = @transform_3, window_bounds = array<i64: 1, 16, 128>}]} {
    %c0 = arith.constant 0 : index
    %c0_0 = arith.constant 0 : index
    %c0_1 = arith.constant 0 : index
    %0 = vector.load %arg1[%c0, %c0_0, %c0_1] : memref<1x16x128xbf16, #tpu.memory_space<vmem>>, vector<1x16x128xbf16>
    %1 = vector.shape_cast %0 : vector<1x16x128xbf16> to vector<16x128xbf16>
    %c0_2 = arith.constant 0 : index
    %c0_3 = arith.constant 0 : index
    %2 = vector.load %arg2[%c0_2, %c0_3] : memref<128x384xbf16, #tpu.memory_space<vmem>>, vector<128x384xbf16>
    %cst = arith.constant dense<0.000000e+00> : vector<16x384xf32>
    %3 = tpu.matmul %1, %2, %cst {dimension_numbers = #tpu.dot_dimension_numbers<[1], [0], [0], [1], [0, 0, 1, 1], [], []>} : vector<16x128xbf16>, vector<128x384xbf16>, vector<16x384xf32> -> vector<16x384xf32>
    %4 = vector.shape_cast %3 : vector<16x384xf32> to vector<1x16x384xf32>
    %5 = vector.extract_strided_slice %4 {offsets = [0, 0, 0], sizes = [1, 16, 128], strides = [1, 1, 1]} : vector<1x16x384xf32> to vector<1x16x128xf32>
    %6 = arith.truncf %5 : vector<1x16x128xf32> to vector<1x16x128xbf16>
    %7 = vector.extract_strided_slice %4 {offsets = [0, 0, 128], sizes = [1, 16, 128], strides = [1, 1, 1]} : vector<1x16x384xf32> to vector<1x16x128xf32>
    %8 = arith.truncf %7 : vector<1x16x128xf32> to vector<1x16x128xbf16>
    %9 = vector.extract_strided_slice %4 {offsets = [0, 0, 256], sizes = [1, 16, 128], strides = [1, 1, 1]} : vector<1x16x384xf32> to vector<1x16x128xf32>
    %10 = arith.truncf %9 : vector<1x16x128xf32> to vector<1x16x128xbf16>
    "tpu.trace_start"() <{level = 10 : i32, message = "btd,bsd->bts"}> : () -> ()
    %cst_4 = arith.constant dense<0.000000e+00> : vector<1x16x16xf32>
    %11 = tpu.matmul %6, %8, %cst_4 {dimension_numbers = #tpu.dot_dimension_numbers<[2], [2], [1], [1], [0, 0, 0, 1, 1, 1], [0], [0]>} : vector<1x16x128xbf16>, vector<1x16x128xbf16>, vector<1x16x16xf32> -> vector<1x16x16xf32>
    "tpu.trace_stop"() : () -> ()
    %12 = tpu.iota {dimensions = array<i32: 2>} : vector<1x1x16xi32>
    %c8_i32 = arith.constant 8 : i32
    %13 = vector.broadcast %c8_i32 : i32 to vector<1x1x16xi32>
    %14 = arith.cmpi slt, %12, %13 : vector<1x1x16xi32>
    %cst_5 = arith.constant 0.000000e+00 : f32
    %cst_6 = arith.constant -1.000000e+09 : f32
    %15 = vector.broadcast %cst_5 : f32 to vector<1x1x16xf32>
    %16 = vector.broadcast %cst_6 : f32 to vector<1x1x16xf32>
    %17 = arith.select %14, %15, %16 : vector<1x1x16xi1>, vector<1x1x16xf32>
    %18 = vector.broadcast %17 : vector<1x1x16xf32> to vector<1x16x16xf32>
    %19 = arith.addf %11, %18 : vector<1x16x16xf32>
    %cst_7 = arith.constant dense<0xFF800000> : vector<1x16xf32>
    %20 = vector.multi_reduction <maximumf>, %19, %cst_7 [2] : vector<1x16x16xf32> to vector<1x16xf32>
    %21 = vector.shape_cast %20 : vector<1x16xf32> to vector<1x16x1xf32>
    %22 = vector.broadcast %21 : vector<1x16x1xf32> to vector<1x16x16xf32>
    %23 = arith.subf %19, %22 : vector<1x16x16xf32>
    %24 = math.exp %23 : vector<1x16x16xf32>
    %cst_8 = arith.constant dense<0.000000e+00> : vector<1x16xf32>
    %25 = vector.multi_reduction <add>, %24, %cst_8 [2] : vector<1x16x16xf32> to vector<1x16xf32>
    %26 = vector.shape_cast %25 : vector<1x16xf32> to vector<1x16x1xf32>
    %27 = arith.truncf %24 : vector<1x16x16xf32> to vector<1x16x16xbf16>
    "tpu.trace_start"() <{level = 10 : i32, message = "bts,bsd->btd"}> : () -> ()
    %cst_9 = arith.constant dense<0.000000e+00> : vector<1x16x128xf32>
    %28 = tpu.matmul %27, %10, %cst_9 {dimension_numbers = #tpu.dot_dimension_numbers<[2], [1], [1], [2], [0, 0, 0, 1, 1, 2], [0], [0]>} : vector<1x16x16xbf16>, vector<1x16x128xbf16>, vector<1x16x128xf32> -> vector<1x16x128xf32>
    "tpu.trace_stop"() : () -> ()
    %29 = tpu.reciprocal %26 {approx = true} : vector<1x16x1xf32> -> vector<1x16x1xf32>
    %30 = vector.broadcast %29 : vector<1x16x1xf32> to vector<1x16x128xf32>
    %31 = arith.mulf %28, %30 : vector<1x16x128xf32>
    %32 = vector.shape_cast %31 : vector<1x16x128xf32> to vector<16x128xf32>
    %33 = arith.truncf %32 : vector<16x128xf32> to vector<16x128xbf16>
    %c0_10 = arith.constant 0 : index
    %c0_11 = arith.constant 0 : index
    %34 = vector.load %arg3[%c0_10, %c0_11] : memref<128x128xbf16, #tpu.memory_space<vmem>>, vector<128x128xbf16>
    %cst_12 = arith.constant dense<0.000000e+00> : vector<16x128xf32>
    %35 = tpu.matmul %33, %34, %cst_12 {dimension_numbers = #tpu.dot_dimension_numbers<[1], [0], [0], [1], [0, 0, 1, 1], [], []>} : vector<16x128xbf16>, vector<128x128xbf16>, vector<16x128xf32> -> vector<16x128xf32>
    %36 = vector.shape_cast %35 : vector<16x128xf32> to vector<1x16x128xf32>
    %c0_13 = arith.constant 0 : index
    %c0_14 = arith.constant 0 : index
    %c0_15 = arith.constant 0 : index
    %37 = vector.load %arg4[%c0_13, %c0_14, %c0_15] : memref<1x16x128xf32, #tpu.memory_space<vmem>>, vector<1x16x128xf32>
    tpu.vector_store %arg4[%c0_13, %c0_14, %c0_15], %36 {strides = array<i32>} : memref<1x16x128xf32, #tpu.memory_space<vmem>>, vector<1x16x128xf32>,
    return
  }
  func.func @transform_0(%arg0: i32) -> (i32, i32, i32) {
    %c0_i32 = arith.constant 0 : i32
    %c0_i32_0 = arith.constant 0 : i32
    %c0_i32_1 = arith.constant 0 : i32
    return %arg0, %c0_i32, %c0_i32_0 : i32, i32, i32
  }
  func.func @transform_1(%arg0: i32) -> (i32, i32) {
    %c0_i32 = arith.constant 0 : i32
    %c0_i32_0 = arith.constant 0 : i32
    %c0_i32_1 = arith.constant 0 : i32
    return %c0_i32, %c0_i32_0 : i32, i32
  }
  func.func @transform_2(%arg0: i32) -> (i32, i32) {
    %c0_i32 = arith.constant 0 : i32
    %c0_i32_0 = arith.constant 0 : i32
    %c0_i32_1 = arith.constant 0 : i32
    return %c0_i32, %c0_i32_0 : i32, i32
  }
  func.func @transform_3(%arg0: i32) -> (i32, i32, i32) {
    %c0_i32 = arith.constant 0 : i32
    %c0_i32_0 = arith.constant 0 : i32
    %c0_i32_1 = arith.constant 0 : i32
    return %arg0, %c0_i32, %c0_i32_0 : i32, i32, i32
  }
}

</mosaic_0001>

<bundles_post_ra>
// kernel: tpu_custom_call.1
= control target key start
LH: loop header
LB: loop body
LE: loop exit
PB: predicated region body
PF: predicated region fallthrough
CT: control target
= control target key end

     0   :  { %8 = vsyncpa [#allocation3], 0  ;;  %s1518_s0 = inlined_call_operand.hbm [shape: bf16[2,16,128], index: 0, kind: input, shape index: {}]   ;;  %s1519_s1 = inlined_call_operand.hbm [shape: bf16[128,384], index: 1, kind: input, shape index: {}]   ;;  %s1520_s2 = inlined_call_operand.hbm [shape: bf16[128,128], index: 2, kind: input, shape index: {}]   ;;  %s1521_s3 = inlined_call_operand.hbm [shape: f32[2,16,128], index: 3, kind: output, shape index: {}]  }
   0x1   :  { %10 = vsyncpa [#allocation3 + $0x1], 0 }
   0x2   :  { %11 = vsyncpa [#allocation6], 0 }
   0x3   :  { %12 = vsyncpa [#allocation4], 0 }
   0x4   :  { %14 = vsyncpa [#allocation4 + $0x1], 0  ;;  %s1247_s12 = smov 0   ;;  %s1249_s13 = smov 0  }
   0x5   :  { %s1251_s14 = smov 0   ;;  %s1253_s15 = smov 0  }
   0x6 LB: > { %s1268_s16 = sadd.s32 4294967295, %s1211_s15   ;;  %s801_s17 = sadd.s32 4294967294, %s1211_s15   ;;  %s1211_s15 = sphi %s1253_s15, %s1541_s15   ;;  %s1207_s14 = sphi %s1251_s14, %s1540_s14   ;;  %s1203_s13 = sphi %s1249_s13, %s1539_s13   ;;  %s1199_s12 = sphi %s1247_s12, %s1538_s12  }
   0x7   : > { %p40_p0 = scmp.ne.s32.totalorder %s1203_s13, %s1199_s12  ;;  %p1522_p1 = scmp.eq.s32.totalorder %s1268_s16, 0 }
   0x8   : > { %p112_p3 = scmp.eq.s32.totalorder %s801_s17, 1  ;;  %p802_p5 = scmp.ge.s32.totalorder %s1211_s15, 1 }
   0x9   : > { %p1277_p4 = por %p1522_p1, %p40_p0  ;;  %p119_p7 = scmp.lt.s32.totalorder %s1211_s15, 3 }
   0xa   : > { %p1282_p6 = por %p112_p3, %p40_p0  ;;  %s1213_s21 = smov [#allocation5]  }
   0xb   : > { %s1525_s18 = scalar_select %p1277_p4, 1, 0 }
   0xc   : > { %s1526_s19 = scalar_select %p1282_p6, 1, 0 }
   0xd   : > { %p1287_p8 = pnand %p802_p5, %p119_p7  ;;  %s131_s22 = sshll.u32 %s1213_s21, 4  ;;  %s1291_s22 = int_to_ptr.vmem [resolvable:$true] %s131_s22 }
   0xe   : > { %s1214_s24 = smov [#allocation7]   ;;  %s1055_s28 = scalar_lea.hbm %s1519_s1, 3072 }
   0xf   : > { %p941_p9 = pneg %p1287_p8  ;;  %s144_s25 = sshll.u32 %s1214_s24, 4  ;;  %s1302_s25 = int_to_ptr.vmem [resolvable:$true] %s144_s25 }
  0x10   : > { %p1056_p12 = scmp.ne.s32.totalorder %s1519_s1, %s1055_s28  ;;  %p1062_p5 = scmp.lt.u32.totalorder %s1055_s28, %s1519_s1 }
  0x11   : > { %p1298_p11 = pnand %p941_p9, %p1522_p1 }
  0x13   : > { %p1057_p13 = pneg %p1298_p11 }
  0x15   : > { %p1058_p0 = pnand %p1057_p13, %p1056_p12 }
  0x17   : > { %p1059_p3 = pneg %p1058_p0 }
  0x19   : > { %p1064_p7 = pnand %p1062_p5, %p1059_p3 }
  0x1b   : > { %1067 = shalt.err (!%p1064_p7)
}
  0x1c   : > { %s1068_s6 = scalar_lea.vmem %s1291_s22, 3072  ;;  %p1076_p2 = scmp.lt.s32.totalorder %s1291_s22, %s1291_s22 }
  0x1d   : > { %p1069_p9 = scmp.ne.s32.totalorder %s1291_s22, %s1068_s6  ;;  %p1077_p12 = scmp.lt.s32.totalorder %s1068_s6, %s1068_s6 }
  0x1f   : > { %p1071_p10 = pnand %p1069_p9, %p1057_p13  ;;  %p1078_p0 = por %p1077_p12, %p1076_p2 }
  0x21   : > { %p1072_p1 = pneg %p1071_p10 }
  0x23   : > { %p1079_p6 = pnand %p1078_p0, %p1072_p1 }
  0x25   : > { %1082 = shalt.err (!%p1079_p6)
}
  0x26   : > { %s1215_s7 = smov 192   ;;  %s1216_s8 = smov 12  }
  0x27   : > { %944 = dma.hbm_to_vmem [thread:$0]  (!%p1298_p11), %s1519_s1, 3072, %s1291_s22, [#allocation6], %s1215_s7, %s1215_s7, %s1216_s8  }
  0x28   : > { %s1083_s21 = scalar_lea.hbm %s1520_s2, 1024 }
  0x29   : > { %p1084_p2 = scmp.ne.s32.totalorder %s1520_s2, %s1083_s21  ;;  %p1090_p10 = scmp.lt.u32.totalorder %s1083_s21, %s1520_s2 }
  0x2b   : > { %p1086_p1 = pnand %p1084_p2, %p1057_p13 }
  0x2d   : > { %p1087_p6 = pneg %p1086_p1 }
  0x2f   : > { %p1092_p3 = pnand %p1090_p10, %p1087_p6 }
  0x31   : > { %1095 = shalt.err (!%p1092_p3)
}
  0x32   : > { %s1096_s22 = scalar_lea.vmem %s1302_s25, 1024  ;;  %p1104_p12 = scmp.lt.s32.totalorder %s1302_s25, %s1302_s25 }
  0x33   : > { %p1097_p5 = scmp.ne.s32.totalorder %s1302_s25, %s1096_s22  ;;  %p1105_p0 = scmp.lt.s32.totalorder %s1096_s22, %s1096_s22 }
  0x35   : > { %p1099_p7 = pnand %p1097_p5, %p1057_p13  ;;  %p1106_p2 = por %p1105_p0, %p1104_p12 }
  0x37   : > { %p1100_p9 = pneg %p1099_p7 }
  0x39   : > { %p1107_p1 = pnand %p1106_p2, %p1100_p9 }
  0x3b   : > { %1110 = shalt.err (!%p1107_p1)
}
  0x3c   : > { %s1217_s29 = smov 64   ;;  %s1218_s30 = smov 4  }
  0x3d   : > { %947 = dma.hbm_to_vmem [thread:$0]  (!%p1298_p11), %s1520_s2, 1024, %s1302_s25, [#allocation6], %s1217_s29, %s1217_s29, %s1218_s30  }
  0x3e   : > { %s1360_s6 = sadd.s32 1, %s1211_s15   ;;  %s27_s8 = sadd.s32 1, %s1207_s14 }
  0x3f   : > { %s24_s7 = ssub.s32 %s1211_s15, %s1360_s6  ;;  %p34_p6 = scmp.ne.s32.totalorder %s1207_s14, %s1203_s13 }
  0x40   : > { %p25_p13 = scmp.eq.s32.totalorder %s24_s7, 0  ;;  %p35_p10 = scmp.eq.s32.totalorder %s1211_s15, 0 }
  0x41   : > { %p1529_p5 = scmp.eq.s32.totalorder %s1268_s16, 1  ;;  %p958_p9 = scmp.lt.s32.totalorder %s1211_s15, 2 }
  0x42   : > { %s1369_s9 = scalar_select %p25_p13, %s1207_s14, %s27_s8  }
  0x43   : > { %p36_p3 = por %p35_p10, %p34_p6  ;;  %p1373_p7 = por %p1529_p5, %p34_p6 }
  0x44   : > { %s158_s10 = sand.u32 1, %s1207_s14   ;;  %s853_s25 = sshll.u32 %s1211_s15, 7 }
  0x45   : > { %s1530_s23 = scalar_select %p1373_p7, 1, 0 }
  0x46   : > { %s806_s11 = sshll.u32 %s158_s10, 3  ;;  %s1383_s24 = scalar_lea.hbm %s1518_s0, %s853_s25 }
  0x47   : > { %s162_s26 = scalar_lea.vmem [#allocation2], %s806_s11  ;;  %p1387_p11 = pnand %p958_p9, %p36_p3 }
  0x48   : > { %s169_s27 = sshll.u32 %s162_s26, 4  ;;  %s1391_s22 = scalar_lea.sflag [#allocation3], %s158_s10  ;;  %s1385_s27 = int_to_ptr.vmem [resolvable:$true] %s169_s27 }
  0x49   : > { %s1111_s4 = scalar_lea.hbm %s1383_s24, 128  ;;  %p1113_p0 = pneg %p1387_p11 }
  0x4a   : > { %p1112_p12 = scmp.ne.s32.totalorder %s1383_s24, %s1111_s4  ;;  %s1116_s8 = scalar_lea.hbm %s1518_s0, 256 }
  0x4b   : > { %p1117_p13 = scmp.lt.u32.totalorder %s1383_s24, %s1518_s0  ;;  %p1118_p6 = scmp.lt.u32.totalorder %s1116_s8, %s1111_s4 }
  0x4c   : > { %p1114_p2 = pnand %p1113_p0, %p1112_p12  ;;  %p1120_p3 = scmp.lt.u32.totalorder %s1111_s4, %s1383_s24 }
  0x4d   : > { %p1119_p10 = por %p1118_p6, %p1117_p13 }
  0x4e   : > { %p1115_p1 = pneg %p1114_p2 }
  0x4f   : > { %p1121_p5 = por %p1120_p3, %p1119_p10 }
  0x51   : > { %p1122_p9 = pnand %p1121_p5, %p1115_p1 }
  0x53   : > { %1125 = shalt.err (!%p1122_p9)
}
  0x54   : > { %s1126_s10 = scalar_lea.vmem %s1385_s27, 128  ;;  %s1219_s17 = smov [#allocation2]  }
  0x55   : > { %p1127_p12 = scmp.ne.s32.totalorder %s1385_s27, %s1126_s10  ;;  %s1131_s21 = sshll.u32 %s1219_s17, 4  ;;  %s1132_s21 = int_to_ptr.vmem [resolvable:$false] %s1131_s21 }
  0x56   : > { %s1133_s26 = scalar_lea.vmem %s1132_s21, 256  ;;  %p1134_p4 = scmp.lt.s32.totalorder %s1385_s27, %s1132_s21 }
  0x57   : > { %p1129_p2 = pnand %p1127_p12, %p1113_p0  ;;  %p1135_p13 = scmp.lt.s32.totalorder %s1133_s26, %s1126_s10 }
  0x59   : > { %p1130_p7 = pneg %p1129_p2  ;;  %p1136_p6 = por %p1135_p13, %p1134_p4 }
  0x5b   : > { %p1137_p10 = pnand %p1136_p6, %p1130_p7 }
  0x5d   : > { %1140 = shalt.err (!%p1137_p10)
}
  0x5e   : > { %951 = dma.hbm_to_vmem [thread:$0]  (!%p1387_p11), %s1383_s24, 128, %s1385_s27, %s1391_s22, %s1217_s29, %s1217_s29, %s1218_s30  }
  0x5f   : > { %181 = sbr.rel (%p1287_p8) target bundleno = 1189 (0x4a5), region = 32  ;;  %s1425_s4 = sand.u32 (!%p1287_p8), 1, %s1203_s13  }
  0x60   : > { %s810_s5 = sshll.u32 (!%p1287_p8), %s1425_s4, 3  ;;  %s184_s7 = scalar_lea.sflag (!%p1287_p8), [#allocation3], %s1425_s4 }
  0x61   : > { %s1429_s8 = scalar_lea.vmem (!%p1287_p8), [#allocation2], %s810_s5  ;;  %p1532_p4 = scmp.ne.s32.totalorder (!%p1287_p8), %s1525_s18, 0 }
  0x66   : > { %1186 = dma.done.wait (%p1532_p4), %s184_s7, 128  }
  0x67   : > { %1188 = vsyncadd (%p1532_p4), %s184_s7, 4294967168  ;;  %p1533_p7 = scmp.eq.s32.totalorder %s1268_s16, 0 }
  0x69   : > { %1190 = dma.done.wait (%p1533_p7), [#allocation6], 4096   ;;  %p1534_p8 = pmov %p1533_p7 }
  0x6a   : > { %v1220_v0 = vmov 0   ;;  %v1221_v1 = vmov 0.0   ;;  %v1006_v2 = vld [vmem:[#allocation5 + $0x4] ss:$12 sps:$4 sm:$0xff]   ;;  %v1008_v3 = vld [vmem:[#allocation5] ss:$12 sps:$4 sm:$0xff]   ;;  %v474_v38 = vlaneseq }
  0x6b   : > { %1192 = vsyncadd (%p1534_p8), [#allocation6], 4294963200  ;;  %419 = vmatprep.mubr.bf16.mxu0 %v1220_v0  ;;  %877 = vmatprep.subr.bf16.mxu1 %v1221_v1  ;;  %v1009_v4 = vld [vmem:[#allocation5 + $0x1c] ss:$12 sps:$4 sm:$0xff]   ;;  %v1011_v5 = vld [vmem:[#allocation5 + $0x18] ss:$12 sps:$4 sm:$0xff]  }
  0x6c   : > { %387 = vmatprep.subr.bf16.mxu0 %v1006_v2  ;;  %v1012_v6 = vld [vmem:[#allocation5 + $0x34] ss:$12 sps:$4 sm:$0xff]   ;;  %v1014_v7 = vld [vmem:[#allocation5 + $0x30] ss:$12 sps:$4 sm:$0xff]   ;;  %v1015_v8 = vld [vmem:[#allocation5 + $0x4c] ss:$12 sps:$4 sm:$0xff]  }
  0x6d   : > { %388 = vmatpush1.bf16.msra.mxu0 %v1008_v3  ;;  %v1017_v9 = vld [vmem:[#allocation5 + $0x48] ss:$12 sps:$4 sm:$0xff]   ;;  %v1018_v10 = vld [vmem:[#allocation5 + $0x64] ss:$12 sps:$4 sm:$0xff]   ;;  %v1032_v12 = vld [vmem:[#allocation5 + $0x20] ss:$12 sps:$4 sm:$0xff]  }
  0x6e   : > { %389 = vmatprep.subr.bf16.mxu0 %v1009_v4  ;;  %v1031_v11 = vld [vmem:[#allocation5 + $0x8] ss:$12 sps:$4 sm:$0xff]   ;;  %v1020_v13 = vld [vmem:[#allocation5 + $0x60] ss:$12 sps:$4 sm:$0xff]   ;;  %v1023_v15 = vld [vmem:[#allocation5 + $0x78] ss:$12 sps:$4 sm:$0xff]  }
  0x6f   : > { %878 = vmatpush3.bf16.msra.mxu1 %v1031_v11  ;;  %v1021_v14 = vld [vmem:[#allocation5 + $0x7c] ss:$12 sps:$4 sm:$0xff]   ;;  %v1033_v16 = vld [vmem:[#allocation5 + $0x38] ss:$12 sps:$4 sm:$0xff]   ;;  %v1024_v17 = vld [vmem:[#allocation5 + $0x94] ss:$12 sps:$4 sm:$0xff]  }
  0x70   : > { %879 = vmatprep.subr.bf16.mxu1 %v1221_v1  ;;  %v1034_v18 = vld [vmem:[#allocation5 + $0x50] ss:$12 sps:$4 sm:$0xff]   ;;  %v1027_v20 = vld [vmem:[#allocation5 + $0xac] ss:$12 sps:$4 sm:$0xff]   ;;  %v1035_v21 = vld [vmem:[#allocation5 + $0x68] ss:$12 sps:$4 sm:$0xff]  }
  0x71   : > { %390 = vmatpush1.bf16.msra.mxu0 %v1011_v5  ;;  %v1026_v19 = vld [vmem:[#allocation5 + $0x90] ss:$12 sps:$4 sm:$0xff]   ;;  %v1029_v22 = vld [vmem:[#allocation5 + $0xa8] ss:$12 sps:$4 sm:$0xff]   ;;  %v1036_v24 = vld [vmem:[#allocation5 + $0x80] ss:$12 sps:$4 sm:$0xff]  }
  0x72   : > { %391 = vmatprep.subr.bf16.mxu0 %v1012_v6  ;;  %v1030_v23 = vld [vmem:[%s1429_s8] sm:$0xff]   ;;  %vm1222_vm0 = vmmov 0   ;;  %v475_v39 = vand.u32 127, %v474_v38  ;;  %v1223_v40 = vmov -1e+09   ;;  %vm519_vm2 = vcmask 130048  }
  0x73   : > { %880 = vmatpush3.bf16.msra.mxu1 %v1032_v12  ;;  %v1037_v25 = vld [vmem:[#allocation5 + $0x98] ss:$12 sps:$4 sm:$0xff]   ;;  %v1038_v26 = vld [vmem:[#allocation5 + $0xb0] ss:$12 sps:$4 sm:$0xff]   ;;  %893 = vmatprep.mubr.msk.bf16.mxu1 %vm1222_vm0, %v1221_v1  ;;  %v1040_v62 = vld [vmem:[#allocation7 + $0x8] sm:$0xff]   ;;  %s813_s18 = sshll.u32 %s1425_s4, 4 }
  0x74   : > { %881 = vmatprep.subr.bf16.mxu1 %v1221_v1  ;;  %vm476_vm1 = vcmp.lt.s32.totalorder %v475_v39, 8  ;;  %v1039_v61 = vld [vmem:[#allocation7] sm:$0xff]   ;;  %v1041_v63 = vld [vmem:[#allocation7 + $0x10] sm:$0xff]   ;;  %v1042_v0 = vld [vmem:[#allocation7 + $0x18] sm:$0xff]   ;;  %s217_s20 = scalar_lea.vmem [#allocation8], %s813_s18  ;;  %s854_s30 = sshll.u32 %s1268_s16, 8 }
  0x75   : > { %392 = vmatpush1.bf16.msra.mxu0 %v1014_v7  ;;  %v477_v41 = vsel %vm476_vm1, 0.0, %v1223_v40  ;;  %v1043_v2 = vld [vmem:[#allocation7 + $0x20] sm:$0xff]   ;;  %v1044_v3 = vld [vmem:[#allocation7 + $0x28] sm:$0xff]   ;;  %v1045_v4 = vld [vmem:[#allocation7 + $0x30] sm:$0xff]   ;;  %s709_s29 = sshll.u32 %s217_s20, 4  ;;  %s1474_s28 = scalar_lea.hbm %s1521_s3, %s854_s30  ;;  %s1469_s29 = int_to_ptr.vmem [resolvable:$true] %s709_s29 }
  0x76   : > { %393 = vmatprep.subr.bf16.mxu0 %v1015_v8  ;;  %v1046_v5 = vld [vmem:[#allocation7 + $0x38] sm:$0xff]   ;;  %s696_s22 = scalar_lea.sflag [#allocation4], %s1425_s4  ;;  %s1141_s11 = scalar_lea.vmem %s1469_s29, 256 }
  0x77   : > { %882 = vmatpush3.bf16.msra.mxu1 %v1033_v16  ;;  %p1142_p11 = scmp.ne.s32.totalorder %s1469_s29, %s1141_s11  ;;  %p1535_p0 = scmp.ne.s32.totalorder %s1530_s23, 0 }
  0x78   : > { %883 = vmatprep.subr.bf16.mxu1 %v1221_v1  ;;  %s1224_s16 = smov [#allocation8]  }
  0x79   : > { %394 = vmatpush1.bf16.msra.mxu0 %v1017_v9  ;;  %p1143_p1 = pnand %p1142_p11, %p1535_p0  ;;  %s1145_s25 = sshll.u32 %s1224_s16, 4  ;;  %s1146_s25 = int_to_ptr.vmem [resolvable:$false] %s1145_s25 }
  0x7a   : > { %395 = vmatprep.subr.bf16.mxu0 %v1018_v10  ;;  %s1147_s10 = scalar_lea.vmem %s1146_s25, 512  ;;  %p1148_p5 = scmp.lt.s32.totalorder %s1469_s29, %s1146_s25 }
  0x7b   : > { %884 = vmatpush3.bf16.msra.mxu1 %v1034_v18  ;;  %p1144_p3 = pneg %p1143_p1  ;;  %p1149_p9 = scmp.lt.s32.totalorder %s1147_s10, %s1141_s11 }
  0x7c   : > { %885 = vmatprep.subr.bf16.mxu1 %v1221_v1 }
  0x7d   : > { %396 = vmatpush1.bf16.msra.mxu0 %v1020_v13  ;;  %p1150_p12 = por %p1149_p9, %p1148_p5 }
  0x7e   : > { %397 = vmatprep.subr.bf16.mxu0 %v1021_v14 }
  0x7f   : > { %886 = vmatpush3.bf16.msra.mxu1 %v1035_v21  ;;  %p1151_p2 = pnand %p1150_p12, %p1144_p3 }
  0x80   : > { %887 = vmatprep.subr.bf16.mxu1 %v1221_v1 }
  0x81   : > { %398 = vmatpush1.bf16.msra.mxu0 %v1023_v15 }
  0x82   : > { %399 = vmatprep.subr.bf16.mxu0 %v1024_v17 }
  0x83   : > { %888 = vmatpush3.bf16.msra.mxu1 %v1036_v24 }
  0x84   : > { %889 = vmatprep.subr.bf16.mxu1 %v1221_v1 }
  0x85   : > { %400 = vmatpush1.bf16.msra.mxu0 %v1026_v19 }
  0x86   : > { %401 = vmatprep.subr.bf16.mxu0 %v1027_v20 }
  0x87   : > { %890 = vmatpush3.bf16.msra.mxu1 %v1037_v25 }
  0x88   : > { %891 = vmatprep.subr.bf16.mxu1 %v1221_v1 }
  0x89   : > { %402 = vmatpush1.bf16.msra.mxu0 %v1029_v22 }
  0x8a   : > { %909 = vmatprep.subr.bf16.mxu0 %v1221_v1 }
  0x8b   : > { %892 = vmatpush3.bf16.msra.mxu1 %v1038_v26 }
  0x8c   : > { %420 = vmatmul.mubr.bf16.vlgmr.msra.gmra.mrb[0].mxu0 %v1030_v23  ;;  %897 = vmatprep.subr.bf16.mxu1 %v1221_v1 }
  0x8d   : > { %925 = vmatprep.mubr.msk.bf16.mxu0 %vm1222_vm0, %v1221_v1  ;;  %910 = vmatpush3.bf16.msra.mxu0 %v1039_v61 }
  0x8e   : > { %894 = vmatmul.mubr.bf16.vlgmr.msra.gmra.mrb[0].mxu1 %v1030_v23  ;;  %911 = vmatprep.subr.bf16.mxu0 %v1221_v1 }
  0x8f   : > { %899 = vmatprep.mubr.msk.bf16.mxu1 %vm1222_vm0, %v1221_v1 }
  0x91   : > { %912 = vmatpush3.bf16.msra.mxu0 %v1040_v62 }
  0x92   : > { %913 = vmatprep.subr.bf16.mxu0 %v1221_v1 }
  0x95   : > { %914 = vmatpush3.bf16.msra.mxu0 %v1041_v63 }
  0x96   : > { %915 = vmatprep.subr.bf16.mxu0 %v1221_v1 }
  0x99   : > { %916 = vmatpush3.bf16.msra.mxu0 %v1042_v0 }
  0x9a   : > { %917 = vmatprep.subr.bf16.mxu0 %v1221_v1 }
  0x9d   : > { %918 = vmatpush3.bf16.msra.mxu0 %v1043_v2 }
  0x9e   : > { %919 = vmatprep.subr.bf16.mxu0 %v1221_v1 }
  0xa1   : > { %920 = vmatpush3.bf16.msra.mxu0 %v1044_v3 }
  0xa2   : > { %921 = vmatprep.subr.bf16.mxu0 %v1221_v1 }
  0xa5   : > { %922 = vmatpush3.bf16.msra.mxu0 %v1045_v4 }
  0xa6   : > { %923 = vmatprep.subr.bf16.mxu0 %v1221_v1 }
  0xa9   : > { %924 = vmatpush3.bf16.msra.mxu0 %v1046_v5 }
 0x15f   : > { %v421_v27 = vpop.f32.mrb[0].mxu0 }
 0x160   : > { %v423_v28 = vpop.f32.mrb[1].mxu0 }
 0x161   : > { %v425_v29 = vpop.f32.mrb[2].mxu0  ;;  %v464_v33 = vpop.f32.mrb[0].mxu1 }
 0x162   : > { %v471_v30 = vpack.c.bf16 %v425_v29, %v421_v27  ;;  %v427_v31 = vpop.f32.mrb[3].mxu0  ;;  %v895_v34 = vpop.f32.mrb[1].mxu1 }
 0x163   : > { %v472_v32 = vpack.c.bf16 %v427_v31, %v423_v28  ;;  %v467_v35 = vpop.f32.mrb[2].mxu1 }
 0x164   : > { %v473_v36 = vpack.c.bf16 %v467_v35, %v464_v33  ;;  %v896_v37 = vpop.f32.mrb[3].mxu1 }
 0x165   : > { %898 = vmatpush3.bf16.xpose.msra.mxu1 %v472_v32 }
 0x166   : > { %903 = vmatprep.subr.bf16.mxu1 %v1221_v1 }
 0x16c   : > { %900 = vmatmul.mubr.bf16.vlgmr.msra.gmra.mrb[4].mxu1 %v471_v30 }
 0x16d   : > { %905 = vmatprep.mubr.msk.bf16.mxu1 %vm1222_vm0, %v1221_v1  ;;  %904 = vmatpush3.bf16.msra.mxu1 %v473_v36 }
 0x23f   : > { %v512_v42 = vpop.f32.mrb[4].mxu1 }
 0x240   : > { %v513_v43 = vadd.f32 %v512_v42, %v477_v41  ;;  %v901_v44 = vpop.f32.mrb[5].mxu1 }
 0x241   : > { %v515_v45 = vpop.f32.mrb[6].mxu1 }
 0x242   : > { %v516_v46 = vadd.f32 %v515_v45, %v477_v41  ;;  %v902_v47 = vpop.f32.mrb[7].mxu1  ;;  %v520_v48 = vsel %vm519_vm2, %v513_v43, -inf }
 0x243   : > { %521 = vmax.xlane.f32.xlu0 %v520_v48 }
 0x244   : > { %v523_v49 = vsel %vm519_vm2, %v516_v46, -inf }
 0x247   : > { %524 = vmax.xlane.f32.xlu0 %v523_v49 }
 0x2d0   : > { %v522_v50 = vpop.xlane.xlu0 %521 }
 0x2d1   : > { %v526_v51 = vsub.f32 %v513_v43, %v522_v50 }
 0x2d3   : > { %v528_v52 = vmul.f32 1.442695, %v526_v51 }
 0x2d4   : > { %v525_v53 = vpop.xlane.xlu0 %524 }
 0x2d5   : > { %1047 = vpow2.f32 %v528_v52  ;;  %v527_v54 = vsub.f32 %v516_v46, %v525_v53 }
 0x2d7   : > { %v530_v55 = vmul.f32 1.442695, %v527_v54 }
 0x2d9   : > { %1049 = vpow2.f32 %v530_v55 }
 0x2df   : > { %v1048_v56 = vpop.eup %1047 }
 0x2e0   : > { %v532_v57 = vsel %vm519_vm2, %v1048_v56, 0.0 }
 0x2e1   : > { %533 = vadd.xlane.f32.xlu1 %v532_v57 }
 0x2e3   : > { %v1050_v58 = vpop.eup %1049 }
 0x2e4   : > { %v535_v59 = vsel %vm519_vm2, %v1050_v58, 0.0  ;;  %v538_v60 = vpack.c.bf16 %v1050_v58, %v1048_v56 }
 0x2e5   : > { %536 = vadd.xlane.f32.xlu1 %v535_v59 }
 0x2e6   : > { %906 = vmatmul.mubr.msk.bf16.vlgmr.msra.gmra.mrb[8].mxu1 %vm519_vm2, %v538_v60 }
 0x36e   : > { %v534_v6 = vpop.xlane.xlu1 %533 }
 0x36f   : > { %1051 = vrcp.f32 %v534_v6 }
 0x372   : > { %v537_v7 = vpop.xlane.xlu1 %536 }
 0x373   : > { %1053 = vrcp.f32 %v537_v7 }
 0x379   : > { %v1052_v9 = vpop.eup %1051 }
 0x37d   : > { %v1054_v11 = vpop.eup %1053 }
 0x3b9   : > { %v576_v8 = vpop.f32.mrb[8].mxu1 }
 0x3ba   : > { %v907_v10 = vpop.f32.mrb[9].mxu1  ;;  %v585_v13 = vmul.f32 %v1052_v9, %v576_v8 }
 0x3bb   : > { %v579_v12 = vpop.f32.mrb[10].mxu1 }
 0x3bc   : > { %v586_v14 = vmul.f32 %v1054_v11, %v579_v12  ;;  %v908_v15 = vpop.f32.mrb[11].mxu1 }
 0x3be   : > { %v587_v16 = vpack.c.bf16 %v586_v14, %v585_v13 }
 0x3c0   : > { %926 = vmatmul.mubr.bf16.vlgmr.msra.gmra.mrb[4].mxu0 %v587_v16 }
 0x493   : > { %v686_v1 = vpop.f32.mrb[4].mxu0 }
 0x494   : > { %693 = vst [vmem:[%s217_s20] sm:$0xff] %v686_v1  ;;  %v927_v17 = vpop.f32.mrb[5].mxu0 }
 0x495   : > { %v689_v18 = vpop.f32.mrb[6].mxu0 }
 0x496   : > { %694 = vst [vmem:[%s217_s20 + $0x8] sm:$0xff] %v689_v18  ;;  %v928_v19 = vpop.f32.mrb[7].mxu0 }
 0x497   : > { %1154 = shalt.err (!%p1151_p2)
}
 0x498   : > { %s1155_s17 = scalar_lea.hbm %s1474_s28, 256  ;;  %s1159_s5 = scalar_lea.hbm %s1521_s3, 512 }
 0x499   : > { %p1156_p13 = scmp.ne.s32.totalorder %s1474_s28, %s1155_s17  ;;  %p1160_p4 = scmp.lt.u32.totalorder %s1474_s28, %s1521_s3 }
 0x49a   : > { %p1161_p7 = scmp.lt.u32.totalorder %s1159_s5, %s1155_s17  ;;  %p1163_p11 = scmp.lt.u32.totalorder %s1155_s17, %s1474_s28 }
 0x49b   : > { %p1157_p6 = pnand %p1156_p13, %p1535_p0 }
 0x49c   : > { %p1162_p8 = por %p1161_p7, %p1160_p4 }
 0x49d   : > { %p1158_p10 = pneg %p1157_p6 }
 0x49e   : > { %p1164_p1 = por %p1163_p11, %p1162_p8 }
 0x4a0   : > { %p1165_p3 = pnand %p1164_p1, %p1158_p10 }
 0x4a2   : > { %1168 = shalt.err (!%p1165_p3)
}
 0x4a3   : > { %s1225_s18 = smov 128   ;;  %s1226_s20 = smov 8  }
 0x4a4   : > { %939 = dma.vmem_to_hbm [thread:$0]  (%p1535_p0), %s1469_s29, 256, %s1474_s28, %s696_s22, %s1225_s18, %s1225_s18, %s1226_s20  }
 0x4a5 PF: > { %s724_s30 = sand.u32 1, %s1199_s12   ;;  %p1536_p5 = scmp.ne.s32.totalorder %s1526_s19, 0 }
 0x4a6   : > { %p1537_p9 = scmp.ge.s32.totalorder %s1211_s15, 2  ;;  %s725_s24 = scalar_lea.sflag [#allocation4], %s724_s30 }
 0x4a8   : > { %p953_p12 = pnand %p1537_p9, %p1536_p5 }
 0x4aa   : > { %1194 = dma.done.wait (!%p953_p12), %s725_s24, 256  }
 0x4ab   : > { %1196 = vsyncadd (!%p953_p12), %s725_s24, 4294967040  ;;  %p17_p2 = scmp.ge.s32.totalorder %s1360_s6, 4   ;;  %s1538_s12 = smov %s1203_s13 }
 0x4ac   : > { %s1539_s13 = smov %s1207_s14  ;;  %s1540_s14 = smov %s1369_s9 }
 0x4ad   : > { %s1541_s15 = smov %s1360_s6  ;;  %19 = sbr.rel (!%p17_p2) target bundleno = 6 (0x6), region = 85 }
 0x4b4   :  { %730 = vsyncpa [#allocation3], 1 }
 0x4b5   :  { %732 = vsyncpa [#allocation3 + $0x1], 1 }
 0x4b6   :  { %733 = vsyncpa [#allocation6], 1 }
 0x4b7   :  { %734 = vsyncpa [#allocation4], 1 }
 0x4b8   :  { %736 = vsyncpa [#allocation4 + $0x1], 1 }

</bundles_post_ra>
